<compile_context>
chip_gen: v7x
topology: tpu7x:2x2x1
jax: 0.10.0
libtpu: 0.0.40
codegen_flags: <defaults>
</compile_context>

<pallas_src>
import jax
import jax.numpy as jnp
import numpy as np
from jax.experimental import pallas as pl
from jax.experimental.pallas import tpu as pltpu

BN_EPS = 1e-5
_MIB = 1024 * 1024

try:
    _VMEM_CAP = int(pltpu.get_tpu_info().vmem_capacity_bytes)
except Exception:  # pragma: no cover - conservative fallback (v7x per-TC VMEM)
    _VMEM_CAP = 64 * _MIB
# Target for double-buffered input tiles + persistent accumulator scratch.
_VMEM_BUDGET = min(_VMEM_CAP // 2, 64 * _MIB)


# --------------------------------------------------------------------------- #
# Kernels
# --------------------------------------------------------------------------- #
def _pool_fc_single_kernel(x_ref, w_ref, b_ref, o_ref):
    """Whole spatial extent in one block: pool + dot + bias directly.

    x_ref: (TN, C, HW); w_ref: (C, out) f32; b_ref: (1, out) f32; o_ref: (TN, out) f32.
    """
    pooled = jnp.sum(x_ref[...].astype(jnp.float32), axis=-1)            # (TN, C)
    y = jnp.dot(pooled, w_ref[...], preferred_element_type=jnp.float32)  # (TN, out)
    o_ref[...] = y + b_ref[...]


def _pool_fc_accum_kernel(x_ref, w_ref, b_ref, o_ref, acc_ref):
    """Multi-chunk path.

    x_ref: (TN, C, thw) input dtype; acc_ref: (TN, C, thw) f32 persistent scratch.
    Per chunk: elementwise accumulate only (VALU, hides under the DMA).
    Finalize: lane reduction over thw + MXU dot + folded bias.
    """
    hw = pl.program_id(1)

    @pl.when(hw == 0)
    def _():
        acc_ref[...] = jnp.zeros_like(acc_ref)

    acc_ref[...] += x_ref[...].astype(jnp.float32)

    @pl.when(hw == pl.num_programs(1) - 1)
    def _():
        pooled = jnp.sum(acc_ref[...], axis=-1)                          # (TN, C)
        y = jnp.dot(pooled, w_ref[...], preferred_element_type=jnp.float32)
        o_ref[...] = y + b_ref[...]


# --------------------------------------------------------------------------- #
# Parameter folding (mean scale + Linear bias + eval-mode BN)
# --------------------------------------------------------------------------- #
def _fold_params(params, hw_scale):
    s = params["gamma"].astype(jnp.float32) * jax.lax.rsqrt(
        params["running_var"].astype(jnp.float32) + BN_EPS)              # (out,)
    w_eff = params["w_t"].astype(jnp.float32) * (s / float(hw_scale))[None, :]
    b_eff = (params["b"].astype(jnp.float32)
             - params["running_mean"].astype(jnp.float32)) * s \
            + params["beta"].astype(jnp.float32)
    return w_eff, b_eff[None, :]                                          # (C,out),(1,out)


# --------------------------------------------------------------------------- #
# Tiling policy
# --------------------------------------------------------------------------- #
def _choose_tiles(N, C, HW, itemsize, tile_n=None, tile_hw=None):
    """Pick (TN, thw, n_pad, vmem_need).

    thw divides HW and is a multiple of 128 (or == HW, the full-dim exemption).
    TN divides N when possible; padding N is the rare fallback.
    """
    def vmem_bytes(tn, t):
        b = 2 * tn * C * t * itemsize            # double-buffered input tiles
        if t != HW:                              # multi-chunk -> f32 accumulator
            b += tn * C * t * 4
        return b

    # ---- spatial chunk ----
    if tile_hw is not None:
        thw = int(tile_hw)
        if HW % thw != 0 or not (thw % 128 == 0 or thw == HW):
            raise ValueError("tile_hw must divide HW and be a multiple of 128 "
                             "(or equal HW)")
    elif vmem_bytes(8, HW) <= _VMEM_BUDGET:
        thw = HW                                 # single chunk: no accumulator
    else:
        cands = [t for t in range(128, HW, 128)
                 if HW % t == 0 and vmem_bytes(8, t) <= _VMEM_BUDGET]
        thw = max(cands) if cands else HW        # fallback: one big chunk

    # ---- row block ----
    if tile_n is not None:
        tn = int(tile_n)
    elif N <= 8:
        tn = N                                   # block == full dim: no pad needed
    else:
        tn = 8
        for cand in (64, 32, 16):
            if N % cand == 0 and vmem_bytes(cand, thw) <= _VMEM_BUDGET:
                tn = cand
                break
    n_pad = (-N) % tn                            # usually 0; pad is rare fallback
    return tn, thw, n_pad, vmem_bytes(tn, thw)


# --------------------------------------------------------------------------- #
# Forward
# --------------------------------------------------------------------------- #
def bbox_regressor_forward(x, params, *, tile_n=None, tile_hw=None):
    """x: (N, C, H, W) or (N, C), float32 or bfloat16. Returns (N, 4*num_classes) f32."""
    if x.ndim == 4 and x.shape[2] * x.shape[3] == 1:
        x = jnp.reshape(x, (x.shape[0], x.shape[1]))   # nothing to pool

    if x.ndim == 2:
        # Already pooled: per review, a thw=1 pooling grid is pure overhead —
        # just do the folded linear in XLA.
        w_eff, b_eff = _fold_params(params, 1)
        return jnp.dot(x.astype(jnp.float32), w_eff,
                       preferred_element_type=jnp.float32) + b_eff
    if x.ndim != 4:
        raise ValueError("expected 2D or 4D input")

    N, C, H, W = x.shape
    HW = H * W
    x3 = jnp.reshape(x, (N, C, HW))                    # contiguous collapse: free
    w_eff, b_eff = _fold_params(params, HW)
    out_dim = w_eff.shape[1]

    tn, thw, n_pad, vmem_need = _choose_tiles(
        N, C, HW, jnp.dtype(x.dtype).itemsize, tile_n=tile_n, tile_hw=tile_hw)

    if n_pad:
        # Rare fallback (N >= 8 and not a multiple of 8): costs one extra HBM
        # pass of x. Typical proposal counts (multiples of 8/16/32) skip this.
        x3 = jnp.pad(x3, ((0, n_pad), (0, 0), (0, 0)))
    Np = N + n_pad
    n_hw = HW // thw

    vmem_limit = int(min(max(32 * _MIB, vmem_need + 4 * _MIB),
                         max(_VMEM_CAP, 32 * _MIB)))

    if n_hw == 1:
        grid = (Np // tn,)
        kernel = _pool_fc_single_kernel
        in_specs = [
            pl.BlockSpec((tn, C, HW), lambda i: (i, 0, 0)),
            pl.BlockSpec((C, out_dim), lambda i: (0, 0)),
            pl.BlockSpec((1, out_dim), lambda i: (0, 0)),
        ]
        out_specs = pl.BlockSpec((tn, out_dim), lambda i: (i, 0))
        scratch = []
        dim_sem = ("parallel",)
    else:
        grid = (Np // tn, n_hw)                         # reduction (HW) axis last
        kernel = _pool_fc_accum_kernel
        in_specs = [
            pl.BlockSpec((tn, C, thw), lambda i, j: (i, 0, j)),
            pl.BlockSpec((C, out_dim), lambda i, j: (0, 0)),
            pl.BlockSpec((1, out_dim), lambda i, j: (0, 0)),
        ]
        out_specs = pl.BlockSpec((tn, out_dim), lambda i, j: (i, 0))
        scratch = [pltpu.VMEM((tn, C, thw), jnp.float32)]
        dim_sem = ("parallel", "arbitrary")

    out = pl.pallas_call(
        kernel,
        out_shape=jax.ShapeDtypeStruct((Np, out_dim), jnp.float32),
        grid_spec=pltpu.PrefetchScalarGridSpec(
            num_scalar_prefetch=0,
            grid=grid,
            in_specs=in_specs,
            out_specs=out_specs,
            scratch_shapes=scratch,
        ),
        compiler_params=pltpu.CompilerParams(
            dimension_semantics=dim_sem,
            vmem_limit_bytes=vmem_limit,
        ),
    )(x3, w_eff, b_eff)
    return out[:N] if n_pad else out


# --------------------------------------------------------------------------- #
# Params / reference
# --------------------------------------------------------------------------- #
def init_params(key, in_channels, num_classes=2):
    out_dim = 4 * num_classes
    k_lin, k_bn = jax.random.split(key)
    # nn.Linear: weight ~ N(0, 0.01), bias = 0
    w = 0.01 * jax.random.normal(k_lin, (out_dim, in_channels), jnp.float32)
    b = jnp.zeros((out_dim,), jnp.float32)
    # nn.BatchNorm1d: weight ~ N(0, 0.01), bias = 0, running stats (0, 1)
    gamma = 0.01 * jax.random.normal(k_bn, (out_dim,), jnp.float32)
    beta = jnp.zeros((out_dim,), jnp.float32)
    rm = jnp.zeros((out_dim,), jnp.float32)
    rv = jnp.ones((out_dim,), jnp.float32)
    return {
        "w_t": w.T,          # (C, out) so matmul is (N,C)@(C,out)
        "b": b,
        "gamma": gamma,
        "beta": beta,
        "running_mean": rm,
        "running_var": rv,
    }


def _reference(x, params):
    if x.ndim == 4:
        x = jnp.mean(x.astype(jnp.float32), axis=(2, 3))
    x = x.astype(jnp.float32)
    y = x @ params["w_t"] + params["b"]
    inv = jax.lax.rsqrt(params["running_var"] + BN_EPS)
    return (y - params["running_mean"]) * inv * params["gamma"] + params["beta"]


# --------------------------------------------------------------------------- #
# Self-test
# --------------------------------------------------------------------------- #
if __name__ == "__main__":
    key = jax.random.PRNGKey(0)
    k1, k2, k3, kp = jax.random.split(key, 4)

    C = 4
    params = init_params(kp, in_channels=C, num_classes=2)

    # 1) Small NCHW f32 input (single spatial chunk, TN == N path).
    x = jax.random.normal(k1, (2, C, 16, 16), jnp.float32)
    out = jax.block_until_ready(bbox_regressor_forward(x, params))
    assert out.shape == (2, 8), out.shape
    np.testing.assert_allclose(np.asarray(out), np.asarray(_reference(x, params)),
                               rtol=1e-5, atol=1e-5)

    # 2) Non-128-divisible spatial (7x7) and N=3 (block == full dim, no padding).
    x2 = jax.random.normal(k2, (3, C, 7, 7), jnp.float32)
    out2 = jax.block_until_ready(bbox_regressor_forward(x2, params))
    np.testing.assert_allclose(np.asarray(out2), np.asarray(_reference(x2, params)),
                               rtol=1e-5, atol=1e-5)

    # 3) Multi-chunk accumulator path (force thw=128 -> 2 chunks) with bf16 input.
    C3 = 8
    params3 = init_params(kp, in_channels=C3, num_classes=2)
    x3 = jax.random.normal(k3, (16, C3, 16, 16), jnp.float32).astype(jnp.bfloat16)
    out3 = jax.block_until_ready(bbox_regressor_forward(x3, params3, tile_hw=128))
    ref3 = _reference(x3.astype(jnp.float32), params3)
    np.testing.assert_allclose(np.asarray(out3), np.asarray(ref3),
                               rtol=1e-4, atol=1e-5)

    # 4) Already-pooled 2-D input path (XLA bypass per review).
    x4 = jax.random.normal(k1, (5, C), jnp.float32)
    out4 = jax.block_until_ready(bbox_regressor_forward(x4, params))
    np.testing.assert_allclose(np.asarray(out4), np.asarray(_reference(x4, params)),
                               rtol=1e-5, atol=1e-5)

    print("KERNEL_OK")
</pallas_src>

<mosaic_0001>
module attributes {stable_mosaic.version = 11 : i64} {
  func.func @_pool_fc_single_kernel(%arg0: i32, %arg1: memref<2x4x256xf32, #tpu.memory_space<vmem>>, %arg2: memref<4x8xf32, #tpu.memory_space<vmem>>, %arg3: memref<1x8xf32, #tpu.memory_space<vmem>>, %arg4: memref<2x8xf32, #tpu.memory_space<vmem>>) attributes {dimension_semantics = [#tpu.dimension_semantics<parallel>], iteration_bounds = array<i64: 1>, scalar_prefetch = 0 : i64, scratch_operands = 0 : i64, tpu.core_type = #tpu.core_type<tc>, window_params = [{transform_indices = @transform_0, window_bounds = array<i64: 2, 4, 256>}, {pipeline_mode = #tpu.pipeline_mode<synchronous>, transform_indices = @transform_1, window_bounds = array<i64: 4, 8>}, {pipeline_mode = #tpu.pipeline_mode<synchronous>, transform_indices = @transform_2, window_bounds = array<i64: 1, 8>}, {transform_indices = @transform_3, window_bounds = array<i64: 2, 8>}]} {
    %c0 = arith.constant 0 : index
    %c0_0 = arith.constant 0 : index
    %c0_1 = arith.constant 0 : index
    %0 = vector.load %arg1[%c0, %c0_0, %c0_1] : memref<2x4x256xf32, #tpu.memory_space<vmem>>, vector<2x4x256xf32>
    %cst = arith.constant dense<0.000000e+00> : vector<2x4xf32>
    %1 = vector.multi_reduction <add>, %0, %cst [2] : vector<2x4x256xf32> to vector<2x4xf32>
    %c0_2 = arith.constant 0 : index
    %c0_3 = arith.constant 0 : index
    %2 = vector.load %arg2[%c0_2, %c0_3] : memref<4x8xf32, #tpu.memory_space<vmem>>, vector<4x8xf32>
    %cst_4 = arith.constant dense<0.000000e+00> : vector<2x8xf32>
    %3 = tpu.matmul %1, %2, %cst_4 {dimension_numbers = #tpu.dot_dimension_numbers<[1], [0], [0], [1], [0, 0, 1, 1], [], []>} : vector<2x4xf32>, vector<4x8xf32>, vector<2x8xf32> -> vector<2x8xf32>
    %c0_5 = arith.constant 0 : index
    %c0_6 = arith.constant 0 : index
    %4 = vector.load %arg3[%c0_5, %c0_6] : memref<1x8xf32, #tpu.memory_space<vmem>>, vector<1x8xf32>
    %5 = vector.broadcast %4 : vector<1x8xf32> to vector<2x8xf32>
    %6 = arith.addf %3, %5 : vector<2x8xf32>
    %c0_7 = arith.constant 0 : index
    %c0_8 = arith.constant 0 : index
    %7 = vector.load %arg4[%c0_7, %c0_8] : memref<2x8xf32, #tpu.memory_space<vmem>>, vector<2x8xf32>
    tpu.vector_store %arg4[%c0_7, %c0_8], %6 {strides = array<i32>} : memref<2x8xf32, #tpu.memory_space<vmem>>, vector<2x8xf32>,
    return
  }
  func.func @transform_0(%arg0: i32) -> (i32, i32, i32) {
    %c0_i32 = arith.constant 0 : i32
    %c0_i32_0 = arith.constant 0 : i32
    %c0_i32_1 = arith.constant 0 : i32
    return %arg0, %c0_i32, %c0_i32_0 : i32, i32, i32
  }
  func.func @transform_1(%arg0: i32) -> (i32, i32) {
    %c0_i32 = arith.constant 0 : i32
    %c0_i32_0 = arith.constant 0 : i32
    %c0_i32_1 = arith.constant 0 : i32
    return %c0_i32, %c0_i32_0 : i32, i32
  }
  func.func @transform_2(%arg0: i32) -> (i32, i32) {
    %c0_i32 = arith.constant 0 : i32
    %c0_i32_0 = arith.constant 0 : i32
    %c0_i32_1 = arith.constant 0 : i32
    return %c0_i32, %c0_i32_0 : i32, i32
  }
  func.func @transform_3(%arg0: i32) -> (i32, i32) {
    %c0_i32 = arith.constant 0 : i32
    %c0_i32_0 = arith.constant 0 : i32
    return %arg0, %c0_i32 : i32, i32
  }
}

</mosaic_0001>

<bundles_post_ra>
// kernel: tpu_custom_call.1
= control target key start
LH: loop header
LB: loop body
LE: loop exit
PB: predicated region body
PF: predicated region fallthrough
CT: control target
= control target key end

     0   :  { %8 = vsyncpa [#allocation3], 0  ;;  %s338_s0 = inlined_call_operand.hbm [shape: f32[2,4,256], index: 0, kind: input, shape index: {}]   ;;  %s339_s1 = inlined_call_operand.hbm [shape: f32[4,8], index: 1, kind: input, shape index: {}]   ;;  %s340_s2 = inlined_call_operand.vmem [shape: f32[1,8], index: 2, kind: input, shape index: {}]   ;;  %s341_s3 = inlined_call_operand.hbm [shape: f32[2,8], index: 3, kind: output, shape index: {}]  }
   0x1   :  { %9 = vsyncpa [#allocation6], 0 }
   0x2   :  { %10 = vsyncpa [#allocation4], 0  ;;  %s267_s12 = smov [#allocation2]   ;;  %s195_s16 = scalar_lea.hbm %s338_s0, 256 }
   0x3   :  { %s16_s13 = sshll.u32 %s267_s12, 4  ;;  %p196_p0 = scmp.ne.s32.totalorder %s338_s0, %s195_s16  ;;  %s17_s13 = int_to_ptr.vmem [resolvable:$true] %s16_s13 }
   0x4   :  { %p199_p1 = scmp.lt.u32.totalorder %s195_s16, %s338_s0 }
   0x6   :  { %p201_p2 = pnand %p199_p1, %p196_p0 }
   0x8   :  { %204 = shalt.err (!%p201_p2)
}
   0x9   :  { %s205_s21 = scalar_lea.vmem %s17_s13, 256  ;;  %p210_p4 = scmp.lt.s32.totalorder %s17_s13, %s17_s13 }
   0xa   :  { %p206_p3 = scmp.ne.s32.totalorder %s17_s13, %s205_s21  ;;  %p211_p5 = scmp.lt.s32.totalorder %s205_s21, %s205_s21 }
   0xc   :  { %p212_p6 = por %p211_p5, %p210_p4 }
   0xe   :  { %p213_p7 = pnand %p212_p6, %p206_p3 }
  0x10   :  { %216 = shalt.err (!%p213_p7)
}
  0x11   :  { %s268_s22 = smov 128   ;;  %s269_s23 = smov 8  }
  0x12   :  { %22 = dma.hbm_to_vmem [thread:$0]  %s338_s0, 256, %s17_s13, [#allocation3], %s268_s22, %s268_s22, %s269_s23  }
  0x13   :  { %s270_s26 = smov [#allocation5]   ;;  %s217_s30 = scalar_lea.hbm %s339_s1, 64 }
  0x14   :  { %s29_s27 = sshll.u32 %s270_s26, 4  ;;  %p218_p8 = scmp.ne.s32.totalorder %s339_s1, %s217_s30  ;;  %s30_s27 = int_to_ptr.vmem [resolvable:$true] %s29_s27 }
  0x15   :  { %p221_p9 = scmp.lt.u32.totalorder %s217_s30, %s339_s1 }
  0x17   :  { %p223_p10 = pnand %p221_p9, %p218_p8 }
  0x19   :  { %226 = shalt.err (!%p223_p10)
}
  0x1a   :  { %s227_s8 = scalar_lea.vmem %s30_s27, 64  ;;  %p232_p12 = scmp.lt.s32.totalorder %s30_s27, %s30_s27 }
  0x1b   :  { %p228_p11 = scmp.ne.s32.totalorder %s30_s27, %s227_s8  ;;  %p233_p13 = scmp.lt.s32.totalorder %s227_s8, %s227_s8 }
  0x1d   :  { %p234_p0 = por %p233_p13, %p232_p12 }
  0x1f   :  { %p235_p1 = pnand %p234_p0, %p228_p11 }
  0x21   :  { %238 = shalt.err (!%p235_p1)
}
  0x22   :  { %32 = dma.hbm_to_vmem [thread:$0]  %s339_s1, 64, %s30_s27, [#allocation6]  }
  0x23   :  { %261 = dma.done.wait [#allocation3], 256  }
  0x24   :  { %262 = vsyncadd [#allocation3], 4294967040 }
  0x25   :  { %263 = dma.done.wait [#allocation6], 64  }
  0x26   :  { %264 = vsyncadd [#allocation6], 4294967232  ;;  %vm49_vm0 = vcmask 1043456   ;;  %v41_v0 = vld [vmem:[#allocation2] sm:$0xff]  ;;  %v42_v1 = vld [vmem:[#allocation2 + $0x8] sm:$0xff]  ;;  %v271_v11 = vmov 0.0   ;;  %v70_v12 = vlaneseq }
  0x27   :  { %v45_v2 = vcombine.high %v41_v0, %v41_v0  ;;  %v50_v3 = vsel %vm49_vm0, %v41_v0, 0.0  ;;  %v46_v4 = vcombine.high %v42_v1, %v42_v1  ;;  %v55_v6 = vsel %vm49_vm0, %v42_v1, 0.0  ;;  %v60_v10 = vld [vmem:[#allocation5] sm:$0xf]  ;;  %181 = vmatprep.subr.mxu0 %v271_v11  ;;  %v176_v21 = vld [vmem:[%s340_s2] ss:$0 sm:$0xff] }
  0x28   :  { %vm272_vm1 = vmmov 0   ;;  %182 = vmatpush3.msk.msra.mxu0 %vm49_vm0, %v60_v10  ;;  %v71_v13 = vand.u32 127, %v70_v12  ;;  %v73_v14 = vshrl.u32 %v70_v12, 7  ;;  %vm80_vm2 = vcmask 1041409   ;;  %s273_s11 = smov [#allocation7]  }
  0x29   :  { %v51_v5 = vsel %vm49_vm0, %v45_v2, 0.0  ;;  %v56_v7 = vsel %vm49_vm0, %v46_v4, 0.0  ;;  %183 = vmatprep.mubr.msk.f32.mxu0 %vm272_vm1, %v271_v11  ;;  %vm82_vm3 = vcmask 31744   ;;  %s166_s12 = sshll.u32 %s273_s11, 4  ;;  %vm158_vm4 = vcmask 58368   ;;  %s167_s12 = int_to_ptr.vmem [resolvable:$true] %s166_s12 }
  0x2a   :  { %v52_v8 = vadd.f32 %v51_v5, %v50_v3  ;;  %v57_v9 = vadd.f32 %v56_v7, %v55_v6  ;;  %v74_v16 = vsub.s32 %v71_v13, %v73_v14  ;;  %s239_s13 = scalar_lea.vmem %s167_s12, 32  ;;  %p244_p3 = scmp.lt.s32.totalorder %s167_s12, %s167_s12 }
  0x2b   :  { %p240_p2 = scmp.ne.s32.totalorder %s167_s12, %s239_s13  ;;  %p245_p4 = scmp.lt.s32.totalorder %s239_s13, %s239_s13 }
  0x2c   :  { %53 = vadd.xlane.f32.xlu0 %v52_v8 }
  0x2d   :  { %p246_p5 = por %p245_p4, %p244_p3 }
  0x2f   :  { %p247_p6 = pnand %p246_p5, %p240_p2 }
  0x30   :  { %58 = vadd.xlane.f32.xlu0 %v57_v9 }
  0xb9   :  { %v54_v15 = vpop.xlane.xlu0 %53 }
  0xba   :  { %v75_v18 = vrot.slane %v54_v15, %v74_v16 }
  0xbd   :  { %v59_v17 = vpop.xlane.xlu0 %58 }
  0xbe   :  { %v79_v19 = vrot.slane %v59_v17, %v74_v16 }
  0xc0   :  { %v81_v20 = vsel %vm80_vm2, %v79_v19, %v75_v18 }
  0xc1   :  { %184 = vmatmul.mubr.msk.f32.vlgmr.msra.gmra.mrb[0].mxu0 %vm82_vm3, %v81_v20 }
 0x194   :  { %v154_v22 = vpop.f32.mrb[0].mxu0 }
 0x195   :  { %v155_v23 = vadd.f32 %v176_v21, %v154_v22  ;;  %v185_v24 = vpop.f32.mrb[1].mxu0 }
 0x197   :  { %159 = vst.msk [vmem:[#allocation7] sm:$0x3] %vm158_vm4, %v155_v23 }
 0x198   :  { %250 = shalt.err (!%p247_p6)
}
 0x199   :  { %s251_s16 = scalar_lea.hbm %s341_s3, 32 }
 0x19a   :  { %p252_p7 = scmp.ne.s32.totalorder %s341_s3, %s251_s16  ;;  %p255_p8 = scmp.lt.u32.totalorder %s251_s16, %s341_s3 }
 0x19c   :  { %p257_p9 = pnand %p255_p8, %p252_p7 }
 0x19e   :  { %260 = shalt.err (!%p257_p9)
}
 0x19f   :  { %169 = dma.vmem_to_hbm [thread:$0]  %s167_s12, 32, %s341_s3, [#allocation4]  }
 0x1a0   :  { %265 = dma.done.wait [#allocation4], 32  }
 0x1a1   :  { %266 = vsyncadd [#allocation4], 4294967264 }
 0x1a2   :  { %173 = vsyncpa [#allocation3], 1 }
 0x1a3   :  { %174 = vsyncpa [#allocation6], 1 }
 0x1a4   :  { %175 = vsyncpa [#allocation4], 1 }

</bundles_post_ra>
